<compile_context>
chip_gen: v5e
topology: v5e:2x2
jax: 0.10.0
libtpu: 0.0.40
codegen_flags: <defaults>
</compile_context>

<pallas_src>
import functools

import jax
import jax.numpy as jnp
import numpy as np
from jax import lax
from jax.experimental import pallas as pl
from jax.experimental.pallas import tpu as pltpu

KERNEL_SIZES = (1, 3, 5)
MAX_PAD = max(k // 2 for k in KERNEL_SIZES)        # = 2
BN_EPS = 1e-5
LANE = 128
SUBLANE = 8


def _round_up(x, m):
    return (x + m - 1) // m * m


# ---------------------------------------------------------------------------
# One-off probe: detect pltpu.roll's rotate convention (jnp.roll-like or not)
# so the sublane-shift sign below is correct regardless of JAX version.
# ---------------------------------------------------------------------------
_ROLL_MATCHES_JNP = None


def _roll_probe_kernel(x_ref, o_ref):
    o_ref[...] = pltpu.roll(x_ref[...], 1, 0)


def _roll_matches_jnp():
    """True iff pltpu.roll(x, s, ax)[i] == x[(i - s) % n]  (jnp.roll convention)."""
    global _ROLL_MATCHES_JNP
    if _ROLL_MATCHES_JNP is None:
        x = lax.broadcasted_iota(jnp.float32, (SUBLANE, LANE), 0)
        y = pl.pallas_call(
            _roll_probe_kernel,
            out_shape=jax.ShapeDtypeStruct((SUBLANE, LANE), jnp.float32),
        )(x)
        _ROLL_MATCHES_JNP = bool(np.asarray(y)[0, 0] == float(SUBLANE - 1))
    return _ROLL_MATCHES_JNP


# ---------------------------------------------------------------------------
# Kernel
# ---------------------------------------------------------------------------
def _msdc_kernel(x_hbm, w3_ref, w5_ref, bnp_ref,
                 o1_ref, o2_ref, o3_ref, xbuf, sem,
                 *, chunk_h, roll_like_jnp):
    # x_hbm : (N, Hp, Wp, Cp) padded input, left in HBM (pl.ANY), manual DMA
    # w3_ref: (3, 3, Cp) depthwise weights with BN scale folded in (k=3)
    # w5_ref: (5, 5, Cp) depthwise weights with BN scale folded in (k=5)
    # bnp   : (4, Cp) rows = [w1*scale1, shift1, shift3, shift5]
    # oK_ref: (1, tile_h, W, Cp) output row-tiles
    # xbuf  : (2, tile_h + 2*MAX_PAD, Wp, Cp) double-buffered input scratch
    # sem   : DMA semaphores, shape (2,)
    n = pl.program_id(0)
    h = pl.program_id(1)
    nh = pl.num_programs(1)

    tile_h = o1_ref.shape[1]
    W = o1_ref.shape[2]
    Cp = o1_ref.shape[3]
    tile_h_in = xbuf.shape[1]                      # tile_h + 2*MAX_PAD
    Wp = xbuf.shape[2]                             # sublane-aligned padded width

    def tile_copy(tile_idx, slot):
        return pltpu.make_async_copy(
            x_hbm.at[n, pl.ds(tile_idx * tile_h, tile_h_in)],
            xbuf.at[slot],
            sem.at[slot],
        )

    # Prime the manual input pipeline at the first row-tile of every image.
    # Per-image priming keeps the batch axis megacore-safe ("parallel" on v7x):
    # the sequential DMA chain only spans the "arbitrary" h axis.
    @pl.when(h == 0)
    def _():
        tile_copy(0, 0).start()

    slot = h % 2
    tile_copy(h, slot).wait()

    # Prefetch the next row-tile of this image while computing on this one.
    @pl.when(h + 1 < nh)
    def _():
        tile_copy(h + 1, 1 - slot).start()

    scale1 = bnp_ref[0, :].astype(jnp.float32)     # (Cp,)
    shift1 = bnp_ref[1, :].astype(jnp.float32)
    shift3 = bnp_ref[2, :].astype(jnp.float32)
    shift5 = bnp_ref[3, :].astype(jnp.float32)

    def shifted(slab, dj):
        # slab[:, dj:dj+W, :] realized as an XLU sublane rotation + aligned
        # leading slice (the wrapped elements land in the discarded halo cols).
        if dj == 0:
            return slab[:, :W, :]
        shift = (Wp - dj) if roll_like_jnp else dj
        return pltpu.roll(slab, shift, 1)[:, :W, :]

    n_chunks = tile_h // chunk_h

    @pl.loop(0, n_chunks)
    def _(c):
        row0 = c * chunk_h
        if chunk_h > 1:
            row0 = pl.multiple_of(row0, chunk_h)
        # Per-chunk accumulators are small enough to live in vregs.
        acc3 = jnp.zeros((chunk_h, W, Cp), jnp.float32)
        acc5 = jnp.zeros((chunk_h, W, Cp), jnp.float32)
        for di in range(5):
            # One aligned slab load per di; all five dj windows come from XLU
            # rolls of this register-resident slab (no misaligned vlds).
            slab = xbuf[slot, pl.ds(row0 + di, chunk_h), :, :].astype(jnp.float32)
            for dj in range(5):
                win = shifted(slab, dj)
                acc5 = acc5 + win * w5_ref[di, dj, :]
                if 1 <= di <= 3 and 1 <= dj <= 3:
                    acc3 = acc3 + win * w3_ref[di - 1, dj - 1, :]
                if di == 2 and dj == 2:
                    # k=1 branch: conv weight + BN scale fully folded into scale1.
                    o1_ref[0, pl.ds(row0, chunk_h)] = jnp.clip(
                        win * scale1 + shift1, 0.0, 6.0).astype(o1_ref.dtype)
                if di == 3 and dj == 3:
                    # Last 3x3 tap: the k=3 accumulator is complete, store now.
                    o2_ref[0, pl.ds(row0, chunk_h)] = jnp.clip(
                        acc3 + shift3, 0.0, 6.0).astype(o2_ref.dtype)
        o3_ref[0, pl.ds(row0, chunk_h)] = jnp.clip(
            acc5 + shift5, 0.0, 6.0).astype(o3_ref.dtype)


# ---------------------------------------------------------------------------
# Tiling heuristics
# ---------------------------------------------------------------------------
def _vmem_budget():
    """(working-set budget, vmem_limit_bytes) derived from the chip generation."""
    cap = None
    try:
        cap = getattr(pltpu.get_tpu_info(), "vmem_capacity_bytes", None)
    except Exception:
        cap = None
    if not cap:
        cap = 64 * 2**20                 # conservative fallback (v7x-sized VMEM)
    limit = (cap * 3) // 4               # headroom for compiler-internal scratch
    budget = (limit * 2) // 3            # explicit working set (xbuf + outputs)
    return budget, limit


def _choose_chunk_h(W, Wp, Cp):
    """Rows per inner chunk so acc3+acc5+slab+win (f32) stay within ~40 vregs."""
    per_row = (3 * W + Wp) * Cp          # live f32 elements per chunk row
    budget = 40 * 1024                   # ~40 vregs worth of f32
    ch = max(1, budget // per_row)
    p = 1
    while p * 2 <= min(ch, 8):
        p *= 2
    return p


def _choose_tile_h(H, W, Wp, Cp, itemsize, chunk_h, budget):
    """Largest row tile (multiple of chunk_h) whose working set fits the budget."""
    def need(th):
        xbuf = 2 * (th + 2 * MAX_PAD) * Wp * Cp * itemsize   # manual double buffer
        outs = 3 * 2 * th * W * Cp * itemsize                # 3 pipelined outputs
        return xbuf + outs

    max_th = _round_up(H, chunk_h)
    tile_h = chunk_h
    t = chunk_h
    while t <= max_th:
        if need(t) <= budget:
            tile_h = t
        t += chunk_h
    return tile_h


# ---------------------------------------------------------------------------
# Wrapper
# ---------------------------------------------------------------------------
def msdc_pallas(x_nchw, weights, bn_params):
    """x_nchw: (N, C, H, W).  weights: dict k -> (C, 1, k, k) (PyTorch layout).
    bn_params: dict k -> (gamma, beta, running_mean, running_var), each (C,).
    Returns a list of 3 arrays (N, C, H, W) matching MSDC.forward (eval-mode BN)."""
    N, C, H, W = x_nchw.shape
    dtype = x_nchw.dtype

    Cp = _round_up(C, LANE)                        # lane-dense channel padding
    Wp = _round_up(W + 2 * MAX_PAD, SUBLANE)       # sublane-aligned padded width

    itemsize = jnp.dtype(dtype).itemsize
    budget, vmem_limit = _vmem_budget()
    chunk_h = _choose_chunk_h(W, Wp, Cp)
    tile_h = _choose_tile_h(H, W, Wp, Cp, itemsize, chunk_h, budget)
    nh = -(-H // tile_h)                           # ceil-div; tile_h need not divide H
    H_pad = nh * tile_h

    # NCHW -> NHWC; pad: halo rows/cols, rows up to a tile multiple, channels to Cp.
    x_nhwc = jnp.transpose(x_nchw, (0, 2, 3, 1))
    x_pad = jnp.pad(
        x_nhwc,
        ((0, 0),
         (MAX_PAD, MAX_PAD + (H_pad - H)),
         (MAX_PAD, Wp - W - MAX_PAD),
         (0, Cp - C)))

    def pad_c(v):
        return jnp.pad(v, [(0, 0)] * (v.ndim - 1) + [(0, Cp - C)])

    # Fold eval-mode BN into per-channel scale/shift; fold scale into the weights;
    # fold the k=1 conv entirely into a per-channel scale.
    scale, shift = {}, {}
    for k in KERNEL_SIZES:
        gamma, beta, mean, var = bn_params[k]
        s = gamma / jnp.sqrt(var + BN_EPS)
        scale[k], shift[k] = s, beta - mean * s

    w_kkc = {k: jnp.transpose(weights[k][:, 0], (1, 2, 0)) for k in KERNEL_SIZES}
    w3f = pad_c(w_kkc[3] * scale[3][None, None, :]).astype(jnp.float32)
    w5f = pad_c(w_kkc[5] * scale[5][None, None, :]).astype(jnp.float32)
    bnp = jnp.stack([
        pad_c(w_kkc[1][0, 0, :] * scale[1]),
        pad_c(shift[1]),
        pad_c(shift[3]),
        pad_c(shift[5]),
    ], axis=0).astype(jnp.float32)                                    # (4, Cp)

    out_sds = jax.ShapeDtypeStruct((N, H_pad, W, Cp), dtype)
    out_spec = pl.BlockSpec((1, tile_h, W, Cp), lambda n, h: (n, h, 0, 0))

    def param_spec(shape):
        return pl.BlockSpec(shape, lambda n, h: (0,) * len(shape))

    kernel = functools.partial(_msdc_kernel, chunk_h=chunk_h,
                               roll_like_jnp=_roll_matches_jnp())

    grid_spec = pltpu.PrefetchScalarGridSpec(
        num_scalar_prefetch=0,
        grid=(N, nh),
        in_specs=[
            pl.BlockSpec(memory_space=pl.ANY),     # padded x stays in HBM
            param_spec((3, 3, Cp)),
            param_spec((5, 5, Cp)),
            param_spec((4, Cp)),
        ],
        out_specs=[out_spec, out_spec, out_spec],
        scratch_shapes=[
            pltpu.VMEM((2, tile_h + 2 * MAX_PAD, Wp, Cp), dtype),
            pltpu.SemaphoreType.DMA((2,)),
        ],
    )

    o1, o2, o3 = pl.pallas_call(
        kernel,
        out_shape=(out_sds, out_sds, out_sds),
        grid_spec=grid_spec,
        compiler_params=pltpu.CompilerParams(
            dimension_semantics=("parallel", "arbitrary"),
            vmem_limit_bytes=vmem_limit,
        ),
    )(x_pad, w3f, w5f, bnp)

    # Drop row/channel padding, NHWC -> NCHW to match the PyTorch output layout.
    return [jnp.transpose(o[:, :H, :, :C], (0, 3, 1, 2)) for o in (o1, o2, o3)]


# ---------------------------------------------------------------------------
# Pure-JAX reference + self-check
# ---------------------------------------------------------------------------
def msdc_reference(x_nchw, weights, bn_params):
    """Pure-JAX reference (lax depthwise conv + eval BN + ReLU6)."""
    N, C, H, W = x_nchw.shape
    outs = []
    for k in KERNEL_SIZES:
        p = k // 2
        y = lax.conv_general_dilated(
            x_nchw.astype(jnp.float32), weights[k].astype(jnp.float32),
            window_strides=(1, 1),
            padding=[(p, p), (p, p)],
            dimension_numbers=("NCHW", "OIHW", "NCHW"),
            feature_group_count=C,
        )
        gamma, beta, mean, var = bn_params[k]
        y = (y - mean[None, :, None, None]) / jnp.sqrt(var[None, :, None, None] + BN_EPS)
        y = y * gamma[None, :, None, None] + beta[None, :, None, None]
        outs.append(jnp.clip(y, 0.0, 6.0))
    return outs


if __name__ == "__main__":
    key = jax.random.PRNGKey(0)
    N, C, H, W = 2, 4, 16, 16

    k_x, k_w1, k_w3, k_w5 = jax.random.split(key, 4)
    x = jax.random.normal(k_x, (N, C, H, W), dtype=jnp.float32)

    # Deterministic parameter init matching MSDC.init_weights('normal'):
    # conv weights ~ Normal(0, 0.02), no bias; BN weight=1, bias=0,
    # running_mean=0, running_var=1 (eval-mode semantics).
    wkeys = {1: k_w1, 3: k_w3, 5: k_w5}
    weights = {k: 0.02 * jax.random.normal(wkeys[k], (C, 1, k, k), dtype=jnp.float32)
               for k in KERNEL_SIZES}
    bn_params = {k: (jnp.ones((C,), jnp.float32),   # gamma
                     jnp.zeros((C,), jnp.float32),  # beta
                     jnp.zeros((C,), jnp.float32),  # running_mean
                     jnp.ones((C,), jnp.float32))   # running_var
                 for k in KERNEL_SIZES}

    outs = msdc_pallas(x, weights, bn_params)
    outs = [jax.block_until_ready(o) for o in outs]

    refs = msdc_reference(x, weights, bn_params)
    for o, r in zip(outs, refs):
        np.testing.assert_allclose(np.asarray(o), np.asarray(r), rtol=1e-5, atol=1e-5)

    print("KERNEL_OK")
</pallas_src>

<mosaic_0001>
module attributes {stable_mosaic.version = 11 : i64} {
  func.func @_roll_probe_kernel(%arg0: memref<8x128xf32, #tpu.memory_space<vmem>>, %arg1: memref<8x128xf32, #tpu.memory_space<vmem>>) attributes {dimension_semantics = [], scalar_prefetch = 0 : i64, scratch_operands = 0 : i64, tpu.core_type = #tpu.core_type<tc>} {
    %c0 = arith.constant 0 : index
    %c0_0 = arith.constant 0 : index
    %0 = vector.load %arg0[%c0, %c0_0] : memref<8x128xf32, #tpu.memory_space<vmem>>, vector<8x128xf32>
    %c1_i32 = arith.constant 1 : i32
    %1 = tpu.dynamic_rotate %0 by %c1_i32 dim 0 : vector<8x128xf32>, i32 -> vector<8x128xf32>
    %c0_1 = arith.constant 0 : index
    %c0_2 = arith.constant 0 : index
    %2 = vector.load %arg1[%c0_1, %c0_2] : memref<8x128xf32, #tpu.memory_space<vmem>>, vector<8x128xf32>
    tpu.vector_store %arg1[%c0_1, %c0_2], %1 {strides = array<i32>} : memref<8x128xf32, #tpu.memory_space<vmem>>, vector<8x128xf32>,
    return
  }
}

</mosaic_0001>

<bundles_post_ra>
// kernel: tpu_custom_call.1
= control target key start
LH: loop header
LB: loop body
LE: loop exit
PB: predicated region body
PF: predicated region fallthrough
CT: control target
= control target key end

     0   :  { %6 = vsyncpa [#allocation3], 0  ;;  %s115_s0 = inlined_call_operand.hbm [shape: f32[8,128], index: 0, kind: input, shape index: {}]   ;;  %s116_s1 = inlined_call_operand.hbm [shape: f32[8,128], index: 1, kind: output, shape index: {}]  }
   0x1   :  { %7 = vsyncpa [#allocation4], 0  ;;  %s13_s8 = sshll.u32 %s115_s0, 4  ;;  %s97_s9 = smov [#allocation2]   ;;  %s14_s8 = int_to_ptr.hbm [resolvable:$true] %s13_s8 }
   0x2   :  { %s15_s10 = sshll.u32 %s97_s9, 4  ;;  %s16_s10 = int_to_ptr.vmem [resolvable:$true] %s15_s10 }
   0x3   :  { %18 = dma.hbm_to_vmem [thread:$0]  %s14_s8, 128, %s16_s10, [#allocation3]  }
   0x4   :  { %93 = dma.done.wait [#allocation3], 128  }
   0x5   :  { %94 = vsyncadd [#allocation3], 4294967168  ;;  %s98_s11 = smov [#allocation5]   ;;  %s33_s15 = sshll.u32 %s116_s1, 4  ;;  %v23_v0 = vld [vmem:[#allocation2] sm:$0xff]  ;;  %s34_s15 = int_to_ptr.hbm [resolvable:$true] %s33_s15 }
   0x6   :  { %s31_s12 = sshll.u32 %s98_s11, 4  ;;  %v24_v1 = vrot.slane %v23_v0, 7  ;;  %s32_s12 = int_to_ptr.vmem [resolvable:$true] %s31_s12 }
   0x8   :  { %25 = vst [vmem:[#allocation5] sm:$0xff] %v24_v1 }
   0x9   :  { %36 = dma.vmem_to_hbm [thread:$0]  %s32_s12, 128, %s34_s15, [#allocation4]  }
   0xa   :  { %95 = dma.done.wait [#allocation4], 128  }
   0xb   :  { %96 = vsyncadd [#allocation4], 4294967168 }
   0xc   :  { %41 = vsyncpa [#allocation3], 1 }
   0xd   :  { %42 = vsyncpa [#allocation4], 1 }

</bundles_post_ra>
